<compile_context>
chip_gen: v5e
topology: v5e:2x2
jax: 0.10.0
libtpu: 0.0.40
codegen_flags: <defaults>
</compile_context>

<pallas_src>
import functools

import jax
import jax.numpy as jnp
import numpy as np
from jax import lax
from jax.experimental import pallas as pl
from jax.experimental.pallas import tpu as pltpu

EPS = 1e-5


def _round_up(v, m):
    return (v + m - 1) // m * m


def cpl_kernel(x_ref, pool_ref, bn_ref, w_ref, feats_ref, logits_ref, *, global_row):
    # x_ref:      (Bt, HW, C)      bf16 encoder feature map, channels on lanes
    # pool_ref:   (Bt, NPOOL, HW)  bf16 0/1 pooling weights (grid-invariant,
    #                              pre-broadcast in the wrapper, VMEM-resident)
    # bn_ref:     (2, NPOOL, C)    f32 folded BN: row 0 scale (incl. 1/count), row 1 shift
    # w_ref:      (C, NCp)         f32 fc2 weight, pre-transposed, class-padded
    # feats_ref:  (Bt, NPOOL, C)   f32 BN'd pools (rows 0..P^2-1 patches, row P^2 global)
    # logits_ref: (Bt, NCp)        f32
    x = x_ref[...]                                              # bf16

    # All 10 adaptive-average pools (9 patch windows + global) as one batched
    # bf16 MXU contraction over HW -> f32 window sums.
    pooled = jnp.einsum("bph,bhc->bpc", pool_ref[...], x,
                        preferred_element_type=jnp.float32)     # (Bt, NPOOL, C)

    # Folded inference-mode BatchNorm1d for all 10 necks (one f32 VPU FMA);
    # the pooling 1/count is folded into the scale row.
    bn = pooled * bn_ref[0][None] + bn_ref[1][None]             # (Bt, NPOOL, C) f32
    feats_ref[...] = bn

    # y = fc2(dropout(f_g)); dropout is identity in eval mode.
    f_g = bn[:, global_row, :]                                  # (Bt, C) f32
    logits_ref[...] = jnp.dot(f_g, w_ref[...],
                              preferred_element_type=jnp.float32)


def cpl_classifier_forward(x, params, num_patch=3):
    """Returns (logits, f_g_after_bottleneck, fs_p) like the PyTorch module."""
    B, C, H, W = x.shape
    HW = H * W
    P2 = num_patch * num_patch
    NPOOL = P2 + 1                       # 9 patch pools + 1 global pool
    GIDX = P2                            # row index of the global pool
    NC = params["w_t"].shape[1]
    NCp = _round_up(NC, 128)

    # AdaptiveAvgPool2dCustom window math (matches the PyTorch module exactly).
    sh, sw = H // num_patch, W // num_patch
    kh, kw = H - (num_patch - 1) * sh, W - (num_patch - 1) * sw

    # ---- generation-aware batch tile (largest double-buffered tile that fits) ----
    try:
        vmem_cap = int(pltpu.get_tpu_info().vmem_capacity_bytes)
        if vmem_cap <= 0:
            vmem_cap = 64 << 20
    except Exception:
        vmem_cap = 64 << 20                            # conservative: v7x per-TC
    budget = min(int(0.75 * vmem_cap), 100 << 20)      # ~48 MiB v7x, ~96 MiB v5e/v6e

    # Per-batch-row VMEM cost with the internal (16,128)/(8,128) tile padding.
    x_row = _round_up(HW, 16) * _round_up(C, 128) * 2          # bf16 input
    pool_row = _round_up(NPOOL, 16) * _round_up(HW, 128) * 2   # bf16 resident pool
    feats_row = _round_up(NPOOL, 8) * _round_up(C, 128) * 4    # f32 output
    logit_row = NCp * 4                                        # f32 output
    tmp_row = 2 * _round_up(NPOOL, 8) * _round_up(C, 128) * 4  # pooled / bn temporaries
    per_row = 2 * (x_row + pool_row + feats_row + logit_row) + tmp_row
    resident = 2 * (2 * _round_up(NPOOL, 8) * _round_up(C, 128) * 4
                    + _round_up(C, 8) * NCp * 4)
    margin = 6 << 20
    bt_cap = max(8, min(256, ((budget - resident - margin) // per_row) // 8 * 8))

    Bt = min(bt_cap, _round_up(B, 8))
    if B > 8 and _round_up(B, Bt) // Bt < 2:
        # Keep >= 2 grid steps so v7x's two TensorCores both get a "parallel" step.
        Bt = max(8, _round_up((B + 1) // 2, 8))
    Bp = _round_up(B, Bt)
    grid = (Bp // Bt,)

    # ---- static 0/1 pooling matrix (counts folded into BN scale below) ----
    pool_np = np.zeros((NPOOL, HW), np.float32)
    counts = np.zeros((NPOOL, 1), np.float32)
    for i in range(num_patch):
        for j in range(num_patch):
            w2d = np.zeros((H, W), np.float32)
            w2d[i * sh:i * sh + kh, j * sw:j * sw + kw] = 1.0
            pool_np[i * num_patch + j] = w2d.reshape(-1)
            counts[i * num_patch + j, 0] = float(kh * kw)
    pool_np[GIDX] = 1.0
    counts[GIDX, 0] = float(HW)
    # Grid-invariant, pre-broadcast to the batch tile (resident in VMEM, DMA'd once).
    pool_b = jnp.broadcast_to(jnp.asarray(pool_np, jnp.bfloat16)[None],
                              (Bt, NPOOL, HW))

    # ---- fold the 10 inference BatchNorm1d layers (+ pool 1/count) into scale/shift ----
    g_scale = params["g_gamma"].reshape(C) * lax.rsqrt(params["g_var"].reshape(C) + EPS)
    g_shift = params["g_beta"].reshape(C) - params["g_mean"].reshape(C) * g_scale
    p_scale = params["p_gamma"] * lax.rsqrt(params["p_var"] + EPS)       # (P2, C)
    p_shift = params["p_beta"] - params["p_mean"] * p_scale
    scale = jnp.concatenate([p_scale, g_scale[None]], axis=0) / jnp.asarray(counts)
    shift = jnp.concatenate([p_shift, g_shift[None]], axis=0)
    bn_params = jnp.stack([scale, shift]).astype(jnp.float32)            # (2, NPOOL, C)

    # fc2 weight, pre-transposed (C, num_classes) and lane-padded for the MXU.
    w_t = jnp.pad(params["w_t"].astype(jnp.float32), ((0, 0), (0, NCp - NC)))

    # Lane-dense, bf16, unpadded (HW, C) input layout; only the batch is padded.
    # TODO(synk): a TPU-resident encoder would emit this layout directly.
    x_l = jnp.transpose(x.astype(jnp.bfloat16), (0, 2, 3, 1)).reshape(B, HW, C)
    if Bp != B:
        x_l = jnp.pad(x_l, ((0, Bp - B), (0, 0), (0, 0)))

    in_specs = [
        pl.BlockSpec((Bt, HW, C), lambda b: (b, 0, 0)),       # x tile (pipelined)
        pl.BlockSpec((Bt, NPOOL, HW), lambda b: (0, 0, 0)),   # pool weights (invariant)
        pl.BlockSpec((2, NPOOL, C), lambda b: (0, 0, 0)),     # folded BN scale/shift
        pl.BlockSpec((C, NCp), lambda b: (0, 0)),             # fc2 weight
    ]
    out_specs = (
        pl.BlockSpec((Bt, NPOOL, C), lambda b: (b, 0, 0)),    # BN'd pools
        pl.BlockSpec((Bt, NCp), lambda b: (b, 0)),            # logits
    )
    out_shape = (
        jax.ShapeDtypeStruct((Bp, NPOOL, C), jnp.float32),
        jax.ShapeDtypeStruct((Bp, NCp), jnp.float32),
    )

    feats, logits = pl.pallas_call(
        functools.partial(cpl_kernel, global_row=GIDX),
        grid=grid,
        in_specs=in_specs,
        out_specs=out_specs,
        out_shape=out_shape,
        compiler_params=pltpu.CompilerParams(
            dimension_semantics=("parallel",),
            vmem_limit_bytes=int(budget)),
    )(x_l, pool_b, bn_params, w_t)

    # Un-pad / restore the PyTorch output layouts (cheap wrapper plumbing).
    logits = logits[:B, :NC]                                  # (B, num_classes)
    f_g_bn = feats[:B, GIDX, :]                               # (B, C)
    fs_p = jnp.transpose(feats[:B, :P2, :], (0, 2, 1))        # (B, C, P*P)
    return logits, f_g_bn, fs_p


if __name__ == "__main__":
    B, C, H, W = 16, 96, 14, 14          # small (batch, num_features, spatial, spatial)
    num_classes, num_patch = 20, 3
    P2 = num_patch * num_patch

    key = jax.random.PRNGKey(0)
    kx, kfc, kg, kp = jax.random.split(key, 4)
    x = jax.random.normal(kx, (B, C, H, W), dtype=jnp.float32)

    # fc2 = Linear(num_features, num_classes, bias=False), weight ~ N(0, 0.001)
    # (weights_init_classifier).  BN affine params are 1/0 at init
    # (weights_init_kaiming); non-trivial running stats exercise the fold.
    w_fc2 = 0.001 * jax.random.normal(kfc, (num_classes, C), dtype=jnp.float32)
    kg1, kg2, kg3, kg4 = jax.random.split(kg, 4)
    kp1, kp2, kp3, kp4 = jax.random.split(kp, 4)
    params = dict(
        g_gamma=1.0 + 0.1 * jax.random.normal(kg1, (C,), jnp.float32),
        g_beta=0.05 * jax.random.normal(kg2, (C,), jnp.float32),
        g_mean=0.1 * jax.random.normal(kg3, (C,), jnp.float32),
        g_var=1.0 + 0.2 * jax.random.uniform(kg4, (C,), jnp.float32),
        p_gamma=1.0 + 0.1 * jax.random.normal(kp1, (P2, C), jnp.float32),
        p_beta=0.05 * jax.random.normal(kp2, (P2, C), jnp.float32),
        p_mean=0.1 * jax.random.normal(kp3, (P2, C), jnp.float32),
        p_var=1.0 + 0.2 * jax.random.uniform(kp4, (P2, C), jnp.float32),
        w_t=jnp.asarray(w_fc2.T),        # (C, num_classes), pre-transposed
    )

    logits, f_g_bn, fs_p = jax.block_until_ready(
        cpl_classifier_forward(x, params, num_patch=num_patch))
    assert logits.shape == (B, num_classes)
    assert f_g_bn.shape == (B, C)
    assert fs_p.shape == (B, C, P2)

    # ---- float64 numpy reference (same math, exact oracle) ----
    xn = np.asarray(x, np.float64)
    p64 = {k: np.asarray(v, np.float64) for k, v in params.items()}
    f_g = xn.mean(axis=(2, 3))
    ref_fg = ((f_g - p64["g_mean"]) / np.sqrt(p64["g_var"] + EPS)
              * p64["g_gamma"] + p64["g_beta"])
    sh, sw = H // num_patch, W // num_patch
    kh, kw_ = H - (num_patch - 1) * sh, W - (num_patch - 1) * sw
    parts = []
    for i in range(num_patch):
        for j in range(num_patch):
            win = xn[:, :, i * sh:i * sh + kh, j * sw:j * sw + kw_]
            fp = win.mean(axis=(2, 3))
            k = i * num_patch + j
            parts.append((fp - p64["p_mean"][k]) / np.sqrt(p64["p_var"][k] + EPS)
                         * p64["p_gamma"][k] + p64["p_beta"][k])
    ref_fp = np.stack(parts, axis=-1)
    ref_logits = ref_fg @ p64["w_t"]

    # Tolerances allow for the bf16 x stream + MXU f32 accumulation vs float64.
    np.testing.assert_allclose(np.asarray(f_g_bn), ref_fg, rtol=2e-3, atol=3e-3)
    np.testing.assert_allclose(np.asarray(fs_p), ref_fp, rtol=2e-3, atol=3e-3)
    np.testing.assert_allclose(np.asarray(logits), ref_logits, rtol=1e-2, atol=5e-5)

    print("KERNEL_OK")
</pallas_src>

<mosaic_0001>
module attributes {stable_mosaic.version = 11 : i64} {
  func.func @cpl_kernel(%arg0: i32, %arg1: memref<8x196x96xbf16, #tpu.memory_space<vmem>>, %arg2: memref<8x10x196xbf16, #tpu.memory_space<vmem>>, %arg3: memref<2x10x96xf32, #tpu.memory_space<vmem>>, %arg4: memref<96x128xf32, #tpu.memory_space<vmem>>, %arg5: memref<8x10x96xf32, #tpu.memory_space<vmem>>, %arg6: memref<8x128xf32, #tpu.memory_space<vmem>>) attributes {dimension_semantics = [#tpu.dimension_semantics<parallel>], iteration_bounds = array<i64: 2>, scalar_prefetch = 0 : i64, scratch_operands = 0 : i64, tpu.core_type = #tpu.core_type<tc>, window_params = [{transform_indices = @transform_0, window_bounds = array<i64: 8, 196, 96>}, {pipeline_mode = #tpu.pipeline_mode<synchronous>, transform_indices = @transform_1, window_bounds = array<i64: 8, 10, 196>}, {pipeline_mode = #tpu.pipeline_mode<synchronous>, transform_indices = @transform_2, window_bounds = array<i64: 2, 10, 96>}, {pipeline_mode = #tpu.pipeline_mode<synchronous>, transform_indices = @transform_3, window_bounds = array<i64: 96, 128>}, {transform_indices = @transform_4, window_bounds = array<i64: 8, 10, 96>}, {transform_indices = @transform_5, window_bounds = array<i64: 8, 128>}]} {
    %c0 = arith.constant 0 : index
    %c0_0 = arith.constant 0 : index
    %c0_1 = arith.constant 0 : index
    %0 = vector.load %arg1[%c0, %c0_0, %c0_1] : memref<8x196x96xbf16, #tpu.memory_space<vmem>>, vector<8x196x96xbf16>
    %c0_2 = arith.constant 0 : index
    %c0_3 = arith.constant 0 : index
    %c0_4 = arith.constant 0 : index
    %1 = vector.load %arg2[%c0_2, %c0_3, %c0_4] : memref<8x10x196xbf16, #tpu.memory_space<vmem>>, vector<8x10x196xbf16>
    "tpu.trace_start"() <{level = 10 : i32, message = "bph,bhc->bpc"}> : () -> ()
    %cst = arith.constant dense<0.000000e+00> : vector<8x10x96xf32>
    %2 = tpu.matmul %1, %0, %cst {dimension_numbers = #tpu.dot_dimension_numbers<[2], [1], [1], [2], [0, 0, 0, 1, 1, 2], [0], [0]>} : vector<8x10x196xbf16>, vector<8x196x96xbf16>, vector<8x10x96xf32> -> vector<8x10x96xf32>
    "tpu.trace_stop"() : () -> ()
    %c0_5 = arith.constant 0 : index
    %c0_6 = arith.constant 0 : index
    %c0_7 = arith.constant 0 : index
    %3 = vector.load %arg3[%c0_5, %c0_6, %c0_7] : memref<2x10x96xf32, #tpu.memory_space<vmem>>, vector<1x10x96xf32>
    %4 = vector.shape_cast %3 : vector<1x10x96xf32> to vector<10x96xf32>
    %5 = vector.shape_cast %4 : vector<10x96xf32> to vector<1x10x96xf32>
    %6 = vector.broadcast %5 : vector<1x10x96xf32> to vector<8x10x96xf32>
    %7 = arith.mulf %2, %6 : vector<8x10x96xf32>
    %c1 = arith.constant 1 : index
    %c0_8 = arith.constant 0 : index
    %c0_9 = arith.constant 0 : index
    %8 = vector.load %arg3[%c1, %c0_8, %c0_9] : memref<2x10x96xf32, #tpu.memory_space<vmem>>, vector<1x10x96xf32>
    %9 = vector.shape_cast %8 : vector<1x10x96xf32> to vector<10x96xf32>
    %10 = vector.shape_cast %9 : vector<10x96xf32> to vector<1x10x96xf32>
    %11 = vector.broadcast %10 : vector<1x10x96xf32> to vector<8x10x96xf32>
    %12 = arith.addf %7, %11 : vector<8x10x96xf32>
    %c0_10 = arith.constant 0 : index
    %c0_11 = arith.constant 0 : index
    %c0_12 = arith.constant 0 : index
    %13 = vector.load %arg5[%c0_10, %c0_11, %c0_12] : memref<8x10x96xf32, #tpu.memory_space<vmem>>, vector<8x10x96xf32>
    tpu.vector_store %arg5[%c0_10, %c0_11, %c0_12], %12 {strides = array<i32>} : memref<8x10x96xf32, #tpu.memory_space<vmem>>, vector<8x10x96xf32>,
    %14 = vector.extract_strided_slice %12 {offsets = [0, 9, 0], sizes = [8, 1, 96], strides = [1, 1, 1]} : vector<8x10x96xf32> to vector<8x1x96xf32>
    %15 = vector.shape_cast %14 : vector<8x1x96xf32> to vector<8x96xf32>
    %c0_13 = arith.constant 0 : index
    %c0_14 = arith.constant 0 : index
    %16 = vector.load %arg4[%c0_13, %c0_14] : memref<96x128xf32, #tpu.memory_space<vmem>>, vector<96x128xf32>
    %cst_15 = arith.constant dense<0.000000e+00> : vector<8x128xf32>
    %17 = tpu.matmul %15, %16, %cst_15 {dimension_numbers = #tpu.dot_dimension_numbers<[1], [0], [0], [1], [0, 0, 1, 1], [], []>} : vector<8x96xf32>, vector<96x128xf32>, vector<8x128xf32> -> vector<8x128xf32>
    %c0_16 = arith.constant 0 : index
    %c0_17 = arith.constant 0 : index
    %18 = vector.load %arg6[%c0_16, %c0_17] : memref<8x128xf32, #tpu.memory_space<vmem>>, vector<8x128xf32>
    tpu.vector_store %arg6[%c0_16, %c0_17], %17 {strides = array<i32>} : memref<8x128xf32, #tpu.memory_space<vmem>>, vector<8x128xf32>,
    return
  }
  func.func @transform_0(%arg0: i32) -> (i32, i32, i32) {
    %c0_i32 = arith.constant 0 : i32
    %c0_i32_0 = arith.constant 0 : i32
    %c0_i32_1 = arith.constant 0 : i32
    return %arg0, %c0_i32, %c0_i32_0 : i32, i32, i32
  }
  func.func @transform_1(%arg0: i32) -> (i32, i32, i32) {
    %c0_i32 = arith.constant 0 : i32
    %c0_i32_0 = arith.constant 0 : i32
    %c0_i32_1 = arith.constant 0 : i32
    %c0_i32_2 = arith.constant 0 : i32
    return %c0_i32, %c0_i32_0, %c0_i32_1 : i32, i32, i32
  }
  func.func @transform_2(%arg0: i32) -> (i32, i32, i32) {
    %c0_i32 = arith.constant 0 : i32
    %c0_i32_0 = arith.constant 0 : i32
    %c0_i32_1 = arith.constant 0 : i32
    %c0_i32_2 = arith.constant 0 : i32
    return %c0_i32, %c0_i32_0, %c0_i32_1 : i32, i32, i32
  }
  func.func @transform_3(%arg0: i32) -> (i32, i32) {
    %c0_i32 = arith.constant 0 : i32
    %c0_i32_0 = arith.constant 0 : i32
    %c0_i32_1 = arith.constant 0 : i32
    return %c0_i32, %c0_i32_0 : i32, i32
  }
  func.func @transform_4(%arg0: i32) -> (i32, i32, i32) {
    %c0_i32 = arith.constant 0 : i32
    %c0_i32_0 = arith.constant 0 : i32
    %c0_i32_1 = arith.constant 0 : i32
    return %arg0, %c0_i32, %c0_i32_0 : i32, i32, i32
  }
  func.func @transform_5(%arg0: i32) -> (i32, i32) {
    %c0_i32 = arith.constant 0 : i32
    %c0_i32_0 = arith.constant 0 : i32
    return %arg0, %c0_i32 : i32, i32
  }
}

</mosaic_0001>

<bundles_post_ra>
// kernel: tpu_custom_call.1
= control target key start
LH: loop header
LB: loop body
LE: loop exit
PB: predicated region body
PF: predicated region fallthrough
CT: control target
= control target key end

     0   :  { %11 = vsyncpa [#allocation3], 0  ;;  %s2800_s0 = inlined_call_operand.vmem [shape: bf16[16,196,96], index: 0, kind: input, shape index: {}]   ;;  %s2801_s1 = inlined_call_operand.vmem [shape: bf16[8,10,196], index: 1, kind: input, shape index: {}]   ;;  %s2802_s2 = inlined_call_operand.vmem [shape: f32[2,10,96], index: 2, kind: input, shape index: {}]   ;;  %s2803_s3 = inlined_call_operand.vmem [shape: f32[96,128], index: 3, kind: input, shape index: {}]   ;;  %s2804_s4 = inlined_call_operand.vmem [shape: f32[16,10,96], index: 4, kind: output, shape index: {0}]   ;;  %s2805_s5 = inlined_call_operand.hbm [shape: f32[16,128], index: 5, kind: output, shape index: {1}]  }
   0x1   :  { %13 = vsyncpa [#allocation3 + $0x1], 0  ;;  %s2357_s18 = smov 0   ;;  %s2359_s19 = smov 0  }
   0x2   :  { %s2361_s20 = smov 0   ;;  %s2363_s21 = smov 0  }
   0x3 LB: > { %s1636_s22 = sadd.s32 4294967295, %s2325_s21   ;;  %s1637_s23 = sadd.s32 4294967294, %s2325_s21   ;;  %s2325_s21 = sphi %s2363_s21, %s2811_s21   ;;  %s2321_s20 = sphi %s2361_s20, %s2810_s20   ;;  %s2317_s19 = sphi %s2359_s19, %s2809_s19   ;;  %s2313_s18 = sphi %s2357_s18, %s2808_s18  }
   0x4   : > { %s2380_s24 = sadd.s32 1, %s2325_s21   ;;  %s141_s25 = sadd.s32 1, %s2321_s20 }
   0x5   : > { %s138_s26 = ssub.s32 %s2325_s21, %s2380_s24  ;;  %p151_p0 = scmp.ne.s32.totalorder %s2321_s20, %s2317_s19 }
   0x6   : > { %p139_p1 = scmp.eq.s32.totalorder %s138_s26, 0  ;;  %p152_p2 = scmp.eq.s32.totalorder %s1636_s22, 1 }
   0x7   : > { %p157_p3 = scmp.ne.s32.totalorder %s2317_s19, %s2313_s18  ;;  %p158_p4 = scmp.eq.s32.totalorder %s1637_s23, 1 }
   0x8   : > { %s2390_s27 = scalar_select %p139_p1, %s2321_s20, %s141_s25  }
   0x9   : > { %p2392_p5 = por %p152_p2, %p151_p0  ;;  %p2396_p6 = por %p158_p4, %p157_p3 }
   0xa   : > { %p1640_p7 = scmp.ge.s32.totalorder %s2325_s21, 1  ;;  %p195_p8 = scmp.lt.s32.totalorder %s2325_s21, 3 }
   0xc   : > { %p196_p9 = pnand %p1640_p7, %p195_p8 }
   0xd   : > { %s2402_s30 = sshll.u32 (!%p196_p9), %s1636_s22, 3  ;;  %s227_s8 = sand.u32 (!%p196_p9), 1, %s2317_s19  }
   0xe   : > { %199 = sbr.rel (%p196_p9) target bundleno = 418 (0x1a2), region = 36  ;;  %p231_p10 = scmp.lt.s32.totalorder (!%p196_p9), %s2402_s30, 15 }
   0xf   : > { %s1641_s9 = sshll.u32 (!%p196_p9), %s227_s8, 3  ;;  %s1547_s13 = scalar_lea.hbm (!%p196_p9), %s2805_s5, %s2402_s30 }
  0x10   : > { %s229_s14 = scalar_lea.vmem (!%p196_p9), [#allocation2], %s1641_s9  ;;  %s1551_s16 = sshll.u32 (!%p196_p9), %s1547_s13, 4  ;;  %s1552_s16 = int_to_ptr.hbm [resolvable:$true] %s1551_s16 }
  0x11   : > { %s1549_s15 = sshll.u32 (!%p196_p9), %s229_s14, 4  ;;  %s2277_s17 = sshra.s32 (!%p196_p9), %s1552_s16, 4  ;;  %s1550_s15 = int_to_ptr.vmem [resolvable:$true] %s1549_s15  ;;  %s2278_s17 = int_to_ptr.hbm [resolvable:$true] %s2277_s17 }
  0x12   : > { %s2279_s22 = scalar_lea.hbm (!%p196_p9), %s2278_s17, 8  ;;  %p2284_p0 = scmp.lt.s32.totalorder (!%p196_p9), %s2278_s17, %s2805_s5 }
  0x13   : > { %s2406_s6 = scalar_select %p231_p10, %s2402_s30, 15  ;;  %vm549_vm0 = vcmask 1041408   ;;  %v2209_v28 = vld [vmem:[%s2801_s1 + $0x14] sm:$0xf]  ;;  %v1708_v29 = vld [vmem:[%s2801_s1 + $0x18] sm:$0x10] }
  0x14   : > { %v2207_v31 = vld [vmem:[%s2801_s1 + $0x4] sm:$0xf]  ;;  %v1651_v32 = vld [vmem:[%s2801_s1 + $0x8] sm:$0x10]  ;;  %v1711_v40 = vor.u32 %v2209_v28, %v1708_v29  ;;  %vm545_vm1 = vcmask 556032   ;;  %vm1444_vm2 = vcmask 785408   ;;  %p2280_p11 = scmp.ne.s32.totalorder %s2278_s17, %s2279_s22 }
  0x15   : > { %s2223_s7 = smul.u32 100, %s2406_s6  ;;  %v1654_v38 = vor.u32 %v2207_v31, %v1651_v32  ;;  %v1649_v48 = vld [vmem:[%s2801_s1] sm:$0xf]  ;;  %v2208_v49 = vld [vmem:[%s2801_s1 + $0x4] sm:$0x10]  ;;  %vm1446_vm3 = vcmask 779264  }
  0x16   : > { %v1706_v51 = vld [vmem:[%s2801_s1 + $0x10] sm:$0xf]  ;;  %v2210_v52 = vld [vmem:[%s2801_s1 + $0x14] sm:$0x10]  ;;  %v1650_v55 = vor.u32 %v2208_v49, %v1649_v48  ;;  %vm1483_vm4 = vcmask 1041409   ;;  %vm1486_vm5 = vcmask 1042434   ;;  %p2281_p12 = pnand %p2280_p11, %p2392_p5 }
  0x17   : > { %s2412_s10 = scalar_lea.vmem %s2800_s0, %s2223_s7  ;;  %v1707_v57 = vor.u32 %v2210_v52, %v1706_v51  ;;  %vm1489_vm6 = vcmask 1043459   ;;  %vm1492_vm7 = vcmask 1044484   ;;  %vm1495_vm8 = vcmask 1045509  }
  0x18   : > { %v2118_v0 = vld [vmem:[%s2412_s10 + $0x38] sm:$0xff]  ;;  %v269_v2 = vld [vmem:[%s2412_s10 + $0x60] sm:$0x3]  ;;  %v294_v4 = vld [vmem:[%s2412_s10 + $0xc4] sm:$0x3]  ;;  %vm1498_vm9 = vcmask 1046534   ;;  %p2282_p13 = pneg %p2281_p12 }
  0x19   : > { %v2130_v1 = vld [vmem:[%s2412_s10 + $0x9c] sm:$0xff]  ;;  %v519_v3 = vunpack.c.l.b16 %v269_v2  ;;  %553 = vmatpush.bf16.msra.mxu0 %v2118_v0  ;;  %v639_v5 = vunpack.c.l.b16 %v294_v4  ;;  %v2117_v6 = vld [vmem:[%s2412_s10 + $0x30] sm:$0xff]  ;;  %v2116_v13 = vld [vmem:[%s2412_s10 + $0x28] sm:$0xff]  ;;  %vm1501_vm10 = vcmask 1047559  }
  0x1a   : > { %671 = vmatpush.bf16.msra.mxu2 %v2130_v1  ;;  %v2129_v8 = vld [vmem:[%s2412_s10 + $0x94] sm:$0xff]  ;;  %v2134_v14 = vld [vmem:[%s2412_s10 + $0xbc] sm:$0xff]  ;;  %v2128_v15 = vld [vmem:[%s2412_s10 + $0x8c] sm:$0xff] }
  0x1b   : > { %v532_v7 = vpack.c.b16 %v519_v3, %v519_v3  ;;  %v652_v9 = vpack.c.b16 %v639_v5, %v639_v5  ;;  %v2122_v12 = vld [vmem:[%s2412_s10 + $0x58] sm:$0xff]  ;;  %v2121_v16 = vld [vmem:[%s2412_s10 + $0x50] sm:$0xff]  ;;  %v2115_v17 = vld [vmem:[%s2412_s10 + $0x20] sm:$0xff] }
  0x1c   : > { %v319_v18 = vld [vmem:[%s2412_s10 + $0x128] sm:$0x3]  ;;  %v2133_v19 = vld [vmem:[%s2412_s10 + $0xb4] sm:$0xff]  ;;  %v2132_v24 = vld [vmem:[%s2412_s10 + $0xac] sm:$0xff] }
  0x1d   : > { %v551_v10 = vsel %vm549_vm0, %v532_v7, 0  ;;  %v669_v11 = vsel %vm549_vm0, %v652_v9, 0  ;;  %554 = vmatpush.bf16.msra.mxu0 %v2117_v6  ;;  %v2127_v20 = vld [vmem:[%s2412_s10 + $0x84] sm:$0xff]  ;;  %v757_v21 = vunpack.c.l.b16 %v319_v18  ;;  %v2114_v23 = vld [vmem:[%s2412_s10 + $0x18] sm:$0xff]  ;;  %v2113_v30 = vld [vmem:[%s2412_s10 + $0x10] sm:$0xff] }
  0x1e   : > { %570 = vmatpush.bf16.msra.mxu1 %v551_v10  ;;  %688 = vmatpush.bf16.msra.mxu3 %v669_v11  ;;  %v2120_v22 = vld [vmem:[%s2412_s10 + $0x48] sm:$0xff]  ;;  %v2126_v25 = vld [vmem:[%s2412_s10 + $0x7c] sm:$0xff]  ;;  %v2125_v34 = vld [vmem:[%s2412_s10 + $0x74] sm:$0xff] }
  0x1f   : > { %672 = vmatpush.bf16.msra.mxu2 %v2129_v8  ;;  %v2119_v26 = vld [vmem:[%s2412_s10 + $0x40] sm:$0xff]  ;;  %v770_v27 = vpack.c.b16 %v757_v21, %v757_v21  ;;  %v344_v35 = vld [vmem:[%s2412_s10 + $0x18c] sm:$0x3]  ;;  %v2141_v43 = vld [vmem:[%s2412_s10 + $0xf8] sm:$0xff] }
  0x20   : > { %v2131_v33 = vld [vmem:[%s2412_s10 + $0xa4] sm:$0xff]  ;;  %v875_v41 = vunpack.c.l.b16 %v344_v35  ;;  %v2124_v42 = vld [vmem:[%s2412_s10 + $0x6c] sm:$0xff]  ;;  %v2145_v54 = vld [vmem:[%s2412_s10 + $0x118] sm:$0xff] }
  0x21   : > { %555 = vmatpush.bf16.msra.mxu0 %v2116_v13  ;;  %v2142_v36 = vld [vmem:[%s2412_s10 + $0x100] sm:$0xff]  ;;  %v787_v37 = vsel %vm549_vm0, %v770_v27, 0  ;;  %v2112_v39 = vld [vmem:[%s2412_s10 + $0x8] sm:$0xff]  ;;  %v2140_v53 = vld [vmem:[%s2412_s10 + $0xf0] sm:$0xff] }
  0x22   : > { %571 = vmatpush.bf16.msra.mxu1 %v2122_v12  ;;  %689 = vmatpush.bf16.msra.mxu3 %v2134_v14  ;;  %v2146_v44 = vld [vmem:[%s2412_s10 + $0x120] sm:$0xff]  ;;  %v888_v47 = vpack.c.b16 %v875_v41, %v875_v41  ;;  %v2139_v59 = vld [vmem:[%s2412_s10 + $0xe8] sm:$0xff]  ;;  %v2144_v60 = vld [vmem:[%s2412_s10 + $0x110] sm:$0xff] }
  0x23   : > { %673 = vmatpush.bf16.msra.mxu2 %v2128_v15  ;;  %v2111_v45 = vld [vmem:[%s2412_s10] sm:$0xff]  ;;  %v2152_v63 = vld [vmem:[%s2412_s10 + $0x154] sm:$0xff]  ;;  %v2143_v0 = vld [vmem:[%s2412_s10 + $0x108] sm:$0xff] }
  0x24   : > { %v2123_v46 = vld [vmem:[%s2412_s10 + $0x64] sm:$0xff]  ;;  %v905_v56 = vsel %vm549_vm0, %v888_v47, 0  ;;  %v2153_v58 = vld [vmem:[%s2412_s10 + $0x15c] sm:$0xff]  ;;  %v1765_v2 = vld [vmem:[%s2801_s1 + $0x28] sm:$0x10] }
  0x25   : > { %556 = vmatpush.bf16.msra.mxu0 %v2115_v17  ;;  %v2154_v50 = vld [vmem:[%s2412_s10 + $0x164] sm:$0xff]  ;;  %v2157_v3 = vld [vmem:[%s2412_s10 + $0x17c] sm:$0xff]  ;;  %v2151_v5 = vld [vmem:[%s2412_s10 + $0x14c] sm:$0xff] }
  0x26   : > { %572 = vmatpush.bf16.msra.mxu1 %v2121_v16  ;;  %690 = vmatpush.bf16.msra.mxu3 %v2133_v19  ;;  %v2158_v61 = vld [vmem:[%s2412_s10 + $0x184] sm:$0xff]  ;;  %v369_v7 = vld [vmem:[%s2412_s10 + $0x1f0] sm:$0x3]  ;;  %v2137_v8 = vld [vmem:[%s2412_s10 + $0xd8] sm:$0xff] }
  0x27   : > { %674 = vmatpush.bf16.msra.mxu2 %v2127_v20  ;;  %v2138_v62 = vld [vmem:[%s2412_s10 + $0xe0] sm:$0xff]  ;;  %v2166_v4 = vld [vmem:[%s2412_s10 + $0x1c8] sm:$0xff]  ;;  %v2156_v9 = vld [vmem:[%s2412_s10 + $0x174] sm:$0xff]  ;;  %v993_v11 = vunpack.c.l.b16 %v369_v7 }
  0x28   : > { %v2211_v1 = vld [vmem:[%s2801_s1 + $0x24] sm:$0xf]  ;;  %v2136_v13 = vld [vmem:[%s2412_s10 + $0xd0] sm:$0xff]  ;;  %v2164_v15 = vld [vmem:[%s2412_s10 + $0x1b8] sm:$0xff] }
  0x29   : > { %557 = vmatpush.bf16.msra.mxu0 %v2114_v23  ;;  %v1768_v6 = vor.u32 %v2211_v1, %v1765_v2  ;;  %v2165_v10 = vld [vmem:[%s2412_s10 + $0x1c0] sm:$0xff]  ;;  %v2155_v14 = vld [vmem:[%s2412_s10 + $0x16c] sm:$0xff]  ;;  %v2213_v16 = vld [vmem:[%s2801_s1 + $0x34] sm:$0xf]  ;;  %v1006_v19 = vpack.c.b16 %v993_v11, %v993_v11 }
  0x2a   : > { %573 = vmatpush.bf16.msra.mxu1 %v2120_v22  ;;  %691 = vmatpush.bf16.msra.mxu3 %v2132_v24  ;;  %v2150_v12 = vld [vmem:[%s2412_s10 + $0x144] sm:$0xff]  ;;  %v1822_v17 = vld [vmem:[%s2801_s1 + $0x38] sm:$0x10]  ;;  %v2178_v18 = vld [vmem:[%s2412_s10 + $0x22c] sm:$0xff] }
  0x2b   : > { %675 = vmatpush.bf16.msra.mxu2 %v2126_v25  ;;  %v394_v20 = vld [vmem:[%s2412_s10 + $0x254] sm:$0x3]  ;;  %v2149_v21 = vld [vmem:[%s2412_s10 + $0x13c] sm:$0xff]  ;;  %v2135_v22 = vld [vmem:[%s2412_s10 + $0xc8] sm:$0xff]  ;;  %v1825_v25 = vor.u32 %v2213_v16, %v1822_v17  ;;  %v1023_v28 = vsel %vm549_vm0, %v1006_v19, 0 }
  0x2c   : > { %v1763_v23 = vld [vmem:[%s2801_s1 + $0x20] sm:$0xf]  ;;  %v2212_v24 = vld [vmem:[%s2801_s1 + $0x24] sm:$0x10]  ;;  %v1111_v27 = vunpack.c.l.b16 %v394_v20  ;;  %v2148_v31 = vld [vmem:[%s2412_s10 + $0x134] sm:$0xff] }
  0x2d   : > { %558 = vmatpush.bf16.msra.mxu0 %v2113_v30  ;;  %v2177_v29 = vld [vmem:[%s2412_s10 + $0x224] sm:$0xff]  ;;  %v1764_v30 = vor.u32 %v2212_v24, %v1763_v23  ;;  %v2176_v35 = vld [vmem:[%s2412_s10 + $0x21c] sm:$0xff]  ;;  %v2174_v49 = vld [vmem:[%s2412_s10 + $0x20c] sm:$0xff] }
  0x2e   : > { %574 = vmatpush.bf16.msra.mxu1 %v2119_v26  ;;  %692 = vmatpush.bf16.msra.mxu3 %v2131_v33  ;;  %v2163_v26 = vld [vmem:[%s2412_s10 + $0x1b0] sm:$0xff]  ;;  %v2162_v32 = vld [vmem:[%s2412_s10 + $0x1a8] sm:$0xff]  ;;  %v2160_v47 = vld [vmem:[%s2412_s10 + $0x198] sm:$0xff] }
  0x2f   : > { %676 = vmatpush.bf16.msra.mxu2 %v2125_v34  ;;  %v2170_v33 = vld [vmem:[%s2412_s10 + $0x1e8] sm:$0xff]  ;;  %v1124_v34 = vpack.c.b16 %v1111_v27, %v1111_v27  ;;  %v2168_v48 = vld [vmem:[%s2412_s10 + $0x1d8] sm:$0xff]  ;;  %v2167_v51 = vld [vmem:[%s2412_s10 + $0x1d0] sm:$0xff] }
  0x30   : > { %v2173_v52 = vld [vmem:[%s2412_s10 + $0x204] sm:$0xff]  ;;  %v2172_v2 = vld [vmem:[%s2412_s10 + $0x1fc] sm:$0xff]  ;;  %v2206_v20 = vld [vmem:[%s2412_s10 + $0x314] sm:$0xff] }
  0x31   : > { %1703 = vmatmul.msk.bf16.vlgmr.msra.gmra.mxu1 %vm545_vm1, %v1654_v38  ;;  %559 = vmatpush.bf16.msra.mxu0 %v2112_v39  ;;  %v2214_v38 = vld [vmem:[%s2801_s1 + $0x34] sm:$0x10]  ;;  %v2161_v39 = vld [vmem:[%s2412_s10 + $0x1a0] sm:$0xff]  ;;  %v1141_v41 = vsel %vm549_vm0, %v1124_v34, 0  ;;  %v2186_v23 = vld [vmem:[%s2412_s10 + $0x270] sm:$0xff] }
  0x32   : > { %789 = vmatpush.bf16.msrb.mxu1 %v2142_v36  ;;  %806 = vmatpush.bf16.msrb.mxu3 %v787_v37  ;;  %v2147_v36 = vld [vmem:[%s2412_s10 + $0x12c] sm:$0xff]  ;;  %v2188_v11 = vld [vmem:[%s2412_s10 + $0x280] sm:$0xff]  ;;  %v2187_v19 = vld [vmem:[%s2412_s10 + $0x278] sm:$0xff] }
  0x33   : > { %1760 = vmatmul.msk.bf16.vlgmr.msra.gmra.mxu3 %vm545_vm1, %v1711_v40  ;;  %677 = vmatpush.bf16.msra.mxu2 %v2124_v42  ;;  %v1820_v37 = vld [vmem:[%s2801_s1 + $0x30] sm:$0xf]  ;;  %v2169_v40 = vld [vmem:[%s2412_s10 + $0x1e0] sm:$0xff]  ;;  %v419_v42 = vld [vmem:[%s2412_s10 + $0x2b8] sm:$0x3] }
  0x34   : > { %v2205_v24 = vld [vmem:[%s2412_s10 + $0x30c] sm:$0xff]  ;;  %v2203_v34 = vld [vmem:[%s2412_s10 + $0x2fc] sm:$0xff] }
  0x35   : > { %560 = vmatpush.bf16.msra.mxu0 %v2111_v45  ;;  %v2182_v45 = vld [vmem:[%s2412_s10 + $0x24c] sm:$0xff] }
  0x36   : > { %790 = vmatpush.bf16.msrb.mxu1 %v2141_v43  ;;  %807 = vmatpush.bf16.msrb.mxu3 %v2146_v44  ;;  %v2175_v43 = vld [vmem:[%s2412_s10 + $0x214] sm:$0xff]  ;;  %v1821_v44 = vor.u32 %v2214_v38, %v1820_v37  ;;  %v1993_v27 = vld [vmem:[%s2801_s1 + $0x68] sm:$0x10] }
  0x37   : > { %678 = vmatpush.bf16.msra.mxu2 %v2123_v46  ;;  %v1229_v46 = vunpack.c.l.b16 %v419_v42  ;;  %v2197_v37 = vld [vmem:[%s2412_s10 + $0x2cc] sm:$0xff]  ;;  %v2183_v38 = vld [vmem:[%s2412_s10 + $0x258] sm:$0xff] }
  0x38   : > { %561 = vmatmul.bf16.vlgmr.msra.gmra.mxu0 %v1650_v55  ;;  %v1877_v55 = vld [vmem:[%s2801_s1 + $0x40] sm:$0xf] }
  0x39   : > { %907 = vmatpush.bf16.msrb.mxu0 %v2154_v50  ;;  %v2159_v50 = vld [vmem:[%s2412_s10 + $0x190] sm:$0xff] }
  0x3a   : > { %791 = vmatpush.bf16.msrb.mxu1 %v2140_v53  ;;  %808 = vmatpush.bf16.msrb.mxu3 %v2145_v54  ;;  %v2181_v53 = vld [vmem:[%s2412_s10 + $0x244] sm:$0xff]  ;;  %v1242_v54 = vpack.c.b16 %v1229_v46, %v1229_v46  ;;  %v2222_v46 = vld [vmem:[%s2801_s1 + $0x74] sm:$0x10] }
  0x3b   : > { %924 = vmatpush.bf16.msrb.mxu2 %v905_v56  ;;  %v2216_v56 = vld [vmem:[%s2801_s1 + $0x44] sm:$0x10] }
  0x3c   : > { %679 = vmatmul.bf16.vlgmr.msra.gmra.mxu2 %v1707_v57  ;;  %v444_v57 = vld [vmem:[%s2412_s10 + $0x31c] sm:$0x3] }
  0x3d   : > { %908 = vmatpush.bf16.msrb.mxu0 %v2153_v58  ;;  %v2190_v58 = vld [vmem:[%s2412_s10 + $0x290] sm:$0xff] }
  0x3e   : > { %792 = vmatpush.bf16.msrb.mxu1 %v2139_v59  ;;  %809 = vmatpush.bf16.msrb.mxu3 %v2144_v60  ;;  %v2215_v59 = vld [vmem:[%s2801_s1 + $0x44] sm:$0xf]  ;;  %v1879_v60 = vld [vmem:[%s2801_s1 + $0x48] sm:$0x10] }
  0x3f   : > { %925 = vmatpush.bf16.msrb.mxu2 %v2158_v61  ;;  %v1878_v61 = vor.u32 %v2216_v56, %v1877_v55  ;;  %v1882_v1 = vor.u32 %v2215_v59, %v1879_v60 }
  0x41   : > { %909 = vmatpush.bf16.msrb.mxu0 %v2152_v63  ;;  %v1259_v63 = vsel %vm549_vm0, %v1242_v54, 0 }
  0x42   : > { %793 = vmatpush.bf16.msrb.mxu1 %v2138_v62  ;;  %810 = vmatpush.bf16.msrb.mxu3 %v2143_v0  ;;  %v2180_v62 = vld [vmem:[%s2412_s10 + $0x23c] sm:$0xff]  ;;  %v1347_v0 = vunpack.c.l.b16 %v444_v57 }
  0x43   : > { %926 = vmatpush.bf16.msrb.mxu2 %v2157_v3  ;;  %v2189_v3 = vld [vmem:[%s2412_s10 + $0x288] sm:$0xff] }
  0x44   : > { %v1360_v7 = vpack.c.b16 %v1347_v0, %v1347_v0  ;;  %v2659_v0 = vld [vmem:[%s2802_s2 + $0x18] sm:$0x3] }
  0x45   : > { %910 = vmatpush.bf16.msrb.mxu0 %v2151_v5  ;;  %1817 = vmatmul.msk.bf16.vlgmr.msrb.gmra.mxu3 %vm545_vm1, %v1768_v6  ;;  %v2171_v5 = vld [vmem:[%s2412_s10 + $0x1f4] sm:$0xff] }
  0x46   : > { %1025 = vmatpush.bf16.msra.mxu3 %v2166_v4  ;;  %794 = vmatpush.bf16.msrb.mxu1 %v2137_v8  ;;  %v2194_v4 = vld [vmem:[%s2412_s10 + $0x2b0] sm:$0xff] }
  0x47   : > { %927 = vmatpush.bf16.msrb.mxu2 %v2156_v9  ;;  %v2179_v6 = vld [vmem:[%s2412_s10 + $0x234] sm:$0xff] }
  0x48   : > { %v2202_v8 = vld [vmem:[%s2412_s10 + $0x2f4] sm:$0xff] }
  0x49   : > { %911 = vmatpush.bf16.msrb.mxu0 %v2150_v12  ;;  %v2217_v9 = vld [vmem:[%s2801_s1 + $0x54] sm:$0xf]  ;;  %v1934_v12 = vld [vmem:[%s2801_s1 + $0x50] sm:$0xf] }
  0x4a   : > { %1026 = vmatpush.bf16.msra.mxu3 %v2165_v10  ;;  %795 = vmatpush.bf16.msrb.mxu1 %v2136_v13  ;;  %v1936_v10 = vld [vmem:[%s2801_s1 + $0x58] sm:$0x10]  ;;  %v2218_v13 = vld [vmem:[%s2801_s1 + $0x54] sm:$0x10] }
  0x4b   : > { %928 = vmatpush.bf16.msrb.mxu2 %v2155_v14  ;;  %v2193_v14 = vld [vmem:[%s2412_s10 + $0x2a8] sm:$0xff]  ;;  %v1939_v16 = vor.u32 %v2217_v9, %v1936_v10  ;;  %v1935_v17 = vor.u32 %v2218_v13, %v1934_v12 }
  0x4d   : > { %912 = vmatpush.bf16.msrb.mxu0 %v2149_v21  ;;  %v2192_v21 = vld [vmem:[%s2412_s10 + $0x2a0] sm:$0xff] }
  0x4e   : > { %1027 = vmatpush.bf16.msra.mxu3 %v2164_v15  ;;  %796 = vmatpush.bf16.msrb.mxu1 %v2135_v22  ;;  %v1377_v15 = vsel %vm549_vm0, %v1360_v7, 0  ;;  %v2200_v22 = vld [vmem:[%s2412_s10 + $0x2e4] sm:$0xff] }
  0x4f   : > { %1143 = vmatpush.bf16.msra.mxu2 %v2178_v18  ;;  %v2201_v18 = vld [vmem:[%s2412_s10 + $0x2ec] sm:$0xff] }
  0x50   : > { %1874 = vmatmul.msk.bf16.vlgmr.msrb.gmra.mxu2 %vm545_vm1, %v1825_v25  ;;  %v2191_v25 = vld [vmem:[%s2412_s10 + $0x298] sm:$0xff] }
  0x51   : > { %797 = vmatmul.bf16.vlgmr.msrb.gmra.mxu1 %v1764_v30  ;;  %913 = vmatpush.bf16.msrb.mxu0 %v2148_v31  ;;  %v2204_v31 = vld [vmem:[%s2412_s10 + $0x304] sm:$0xff] }
  0x52   : > { %1028 = vmatpush.bf16.msra.mxu3 %v2163_v26  ;;  %1042 = vmatpush.bf16.msra.mxu1 %v1023_v28  ;;  %v2219_v26 = vld [vmem:[%s2801_s1 + $0x64] sm:$0xf]  ;;  %v2199_v28 = vld [vmem:[%s2412_s10 + $0x2dc] sm:$0xff] }
  0x53   : > { %1144 = vmatpush.bf16.msra.mxu2 %v2177_v29  ;;  %v2185_v29 = vld [vmem:[%s2412_s10 + $0x268] sm:$0xff]  ;;  %v1996_v30 = vor.u32 %v2219_v26, %v1993_v27 }
  0x55   : > { %914 = vmatpush.bf16.msrb.mxu0 %v2147_v36  ;;  %v2050_v36 = vld [vmem:[%s2801_s1 + $0x78] sm:$0x10] }
  0x56   : > { %1029 = vmatpush.bf16.msra.mxu3 %v2162_v32  ;;  %1043 = vmatpush.bf16.msra.mxu1 %v2170_v33  ;;  %v2198_v32 = vld [vmem:[%s2412_s10 + $0x2d4] sm:$0xff]  ;;  %v2184_v33 = vld [vmem:[%s2412_s10 + $0x260] sm:$0xff] }
  0x57   : > { %1145 = vmatpush.bf16.msra.mxu2 %v2176_v35  ;;  %v2221_v35 = vld [vmem:[%s2801_s1 + $0x74] sm:$0xf] }
  0x58   : > { %915 = vmatmul.bf16.vlgmr.msrb.gmra.mxu0 %v1821_v44  ;;  %v2195_v44 = vld [vmem:[%s2412_s10 + $0x2bc] sm:$0xff] }
  0x59   : > { %1160 = vmatpush.bf16.msra.mxu0 %v1141_v41  ;;  %v2220_v41 = vld [vmem:[%s2801_s1 + $0x64] sm:$0x10] }
  0x5a   : > { %1030 = vmatpush.bf16.msra.mxu3 %v2161_v39  ;;  %1044 = vmatpush.bf16.msra.mxu1 %v2169_v40  ;;  %v2053_v39 = vor.u32 %v2221_v35, %v2050_v36  ;;  %v1991_v40 = vld [vmem:[%s2801_s1 + $0x60] sm:$0xf] }
  0x5b   : > { %1146 = vmatpush.bf16.msra.mxu2 %v2175_v43  ;;  %v1992_v42 = vor.u32 %v2220_v41, %v1991_v40  ;;  %v2196_v43 = vld [vmem:[%s2412_s10 + $0x2c4] sm:$0xff]  ;;  %s2110_s10 = sshll.u32 %s2406_s6, 4 }
  0x5c   : > { %s2645_s11 = scalar_lea.vmem %s2804_s4, %s2110_s10  ;;  %v1470_v35 = vld [vmem:[%s2803_s3 + $0x40] sm:$0xff]  ;;  %s2283_s10 = scalar_lea.hbm %s2805_s5, 16 }
  0x5d   : > { %1161 = vmatpush.bf16.msra.mxu0 %v2182_v45  ;;  %v2048_v45 = vld [vmem:[%s2801_s1 + $0x70] sm:$0xf]  ;;  %p2285_p1 = scmp.lt.s32.totalorder %s2283_s10, %s2279_s22 }
  0x5e   : > { %1031 = vmatpush.bf16.msra.mxu3 %v2160_v47  ;;  %1045 = vmatpush.bf16.msra.mxu1 %v2168_v48  ;;  %v2049_v47 = vor.u32 %v2222_v46, %v2048_v45  ;;  %v1466_v45 = vld [vmem:[%s2803_s3 + $0x20] sm:$0xff] }
  0x5f   : > { %1147 = vmatpush.bf16.msra.mxu2 %v2174_v49  ;;  %p2286_p2 = por %p2285_p1, %p2284_p0 }
  0x61   : > { %1162 = vmatpush.bf16.msra.mxu0 %v2181_v53  ;;  %v2639_v53 = vld [vmem:[%s2802_s2 + $0x10] sm:$0xff]  ;;  %p2287_p3 = pnand %p2286_p2, %p2282_p13 }
  0x62   : > { %1032 = vmatpush.bf16.msra.mxu3 %v2159_v50  ;;  %1046 = vmatpush.bf16.msra.mxu1 %v2167_v51  ;;  %v2633_v51 = vld [vmem:[%s2802_s2] sm:$0xff] }
  0x63   : > { %1148 = vmatpush.bf16.msra.mxu2 %v2173_v52 }
  0x65   : > { %1033 = vmatmul.bf16.vlgmr.msra.gmra.mxu3 %v1878_v61  ;;  %1163 = vmatpush.bf16.msra.mxu0 %v2180_v62  ;;  %v2653_v61 = vld [vmem:[%s2802_s2 + $0x8] sm:$0x3] }
  0x66   : > { %1261 = vmatpush.bf16.msrb.mxu1 %v2190_v58  ;;  %1278 = vmatpush.bf16.msrb.mxu3 %v1259_v63 }
  0x67   : > { %1931 = vmatmul.msk.bf16.vlgmr.msra.gmra.mxu1 %vm545_vm1, %v1882_v1  ;;  %1149 = vmatpush.bf16.msra.mxu2 %v2172_v2 }
  0x69   : > { %1164 = vmatpush.bf16.msra.mxu0 %v2179_v6 }
  0x6a   : > { %1262 = vmatpush.bf16.msrb.mxu1 %v2189_v3  ;;  %1279 = vmatpush.bf16.msrb.mxu3 %v2194_v4 }
  0x6b   : > { %1150 = vmatpush.bf16.msra.mxu2 %v2171_v5 }
  0x6c   : > { %1988 = vmatmul.msk.bf16.vlgmr.msra.gmra.mxu0 %vm545_vm1, %v1939_v16 }
  0x6d   : > { %1379 = vmatpush.bf16.msrb.mxu0 %v2202_v8 }
  0x6e   : > { %1263 = vmatpush.bf16.msrb.mxu1 %v2188_v11  ;;  %1280 = vmatpush.bf16.msrb.mxu3 %v2193_v14 }
  0x6f   : > { %1396 = vmatpush.bf16.msrb.mxu2 %v1377_v15 }
  0x70   : > { %1151 = vmatmul.bf16.vlgmr.msra.gmra.mxu2 %v1935_v17 }
  0x71   : > { %1380 = vmatpush.bf16.msrb.mxu0 %v2201_v18 }
  0x72   : > { %1264 = vmatpush.bf16.msrb.mxu1 %v2187_v19  ;;  %1281 = vmatpush.bf16.msrb.mxu3 %v2192_v21 }
  0x73   : > { %1397 = vmatpush.bf16.msrb.mxu2 %v2206_v20 }
  0x75   : > { %1381 = vmatpush.bf16.msrb.mxu0 %v2200_v22 }
  0x76   : > { %1265 = vmatpush.bf16.msrb.mxu1 %v2186_v23  ;;  %1282 = vmatpush.bf16.msrb.mxu3 %v2191_v25 }
  0x77   : > { %1398 = vmatpush.bf16.msrb.mxu2 %v2205_v24 }
  0x79   : > { %1382 = vmatpush.bf16.msrb.mxu0 %v2199_v28  ;;  %2045 = vmatmul.msk.bf16.vlgmr.msrb.gmra.mxu3 %vm545_vm1, %v1996_v30  ;;  %v1473_v28 = vld [vmem:[%s2803_s3 + $0x58] sm:$0xff] }
  0x7a   : > { %1266 = vmatpush.bf16.msrb.mxu1 %v2185_v29  ;;  %1509 = vmatpush.msra.mxu3 %v1473_v28 }
  0x7b   : > { %1399 = vmatpush.bf16.msrb.mxu2 %v2204_v31  ;;  %v1472_v31 = vld [vmem:[%s2803_s3 + $0x50] sm:$0xff] }
  0x7c   : > { %1510 = vmatpush.msra.mxu3 %v1472_v31 }
  0x7d   : > { %1383 = vmatpush.bf16.msrb.mxu0 %v2198_v32 }
  0x7e   : > { %1267 = vmatpush.bf16.msrb.mxu1 %v2184_v33  ;;  %v1471_v33 = vld [vmem:[%s2803_s3 + $0x48] sm:$0xff] }
  0x7f   : > { %1400 = vmatpush.bf16.msrb.mxu2 %v2203_v34  ;;  %1511 = vmatpush.msra.mxu3 %v1471_v33 }
  0x81   : > { %1384 = vmatpush.bf16.msrb.mxu0 %v2197_v37  ;;  %1512 = vmatpush.msra.mxu3 %v1470_v35  ;;  %v1469_v37 = vld [vmem:[%s2803_s3 + $0x38] sm:$0xff] }
  0x82   : > { %1268 = vmatpush.bf16.msrb.mxu1 %v2183_v38  ;;  %2102 = vmatmul.msk.bf16.vlgmr.msrb.gmra.mxu2 %vm545_vm1, %v2053_v39  ;;  %v1468_v39 = vld [vmem:[%s2803_s3 + $0x30] sm:$0xff] }
  0x83   : > { %1513 = vmatpush.msra.mxu3 %v1469_v37 }
  0x85   : > { %1269 = vmatmul.bf16.vlgmr.msrb.gmra.mxu1 %v1992_v42  ;;  %1385 = vmatpush.bf16.msrb.mxu0 %v2196_v43  ;;  %v1467_v43 = vld [vmem:[%s2803_s3 + $0x28] sm:$0xff] }
  0x86   : > { %1514 = vmatpush.msra.mxu3 %v1468_v39 }
  0x88   : > { %1515 = vmatpush.msra.mxu3 %v1467_v43 }
  0x89   : > { %1386 = vmatpush.bf16.msrb.mxu0 %v2195_v44 }
  0x8a   : > { %1516 = vmatpush.msra.mxu3 %v1466_v45 }
  0x8c   : > { %1387 = vmatmul.bf16.vlgmr.msrb.gmra.mxu0 %v2049_v47 }
  0xae   : > { %v576_v48 = vpop.f32.mrf.mxu1 }
  0xb5   : > { %v562_v50 = vpop.f32.mrf.mxu0 }
  0xb6   : > { %v694_v49 = vpop.f32.mrf.mxu3  ;;  %v577_v52 = vadd.f32 %v576_v48, %v562_v50  ;;  %v578_v56 = vpop.f32.mrf.mxu1 }
  0xb8   : > { %v1409_v54 = vmul.f32 %v2633_v51, %v577_v52 }
  0xba   : > { %v1428_v55 = vadd.f32 %v2639_v53, %v1409_v54  ;;  %v1464_v54 = vld [vmem:[%s2803_s3 + $0x10] sm:$0xff] }
  0xbc   : > { %1445 = vst.msk [vmem:[%s2645_s11] sm:$0xff] %vm1444_vm2, %v1428_v55 }
  0xbd   : > { %v564_v60 = vpop.f32.mrf.mxu0 }
  0xbe   : > { %v696_v58 = vpop.f32.mrf.mxu3  ;;  %v579_v62 = vadd.f32 %v578_v56, %v564_v60  ;;  %v1463_v56 = vld [vmem:[%s2803_s3 + $0x8] sm:$0xff] }
  0xbf   : > { %v680_v57 = vpop.f32.mrf.mxu2 }
  0xc0   : > { %v695_v59 = vadd.f32 %v694_v49, %v680_v57  ;;  %v1410_v1 = vmul.f32 %v2653_v61, %v579_v62  ;;  %v1465_v49 = vld [vmem:[%s2803_s3 + $0x18] sm:$0xff] }
  0xc1   : > { %1517 = vmatpush.msra.mxu3 %v1465_v49 }
  0xc2   : > { %v1411_v63 = vmul.f32 %v2633_v51, %v695_v59  ;;  %v1429_v3 = vadd.f32 %v2659_v0, %v1410_v1 }
  0xc3   : > { %1518 = vmatpush.msra.mxu3 %v1464_v54 }
  0xc4   : > { %v1430_v2 = vadd.f32 %v2639_v53, %v1411_v63  ;;  %1447 = vst.msk [vmem:[%s2645_s11 + $0x8] sm:$0x3] %vm1446_vm3, %v1429_v3  ;;  %v1482_v7 = vrot.slane %v1429_v3, 1 }
  0xc5   : > { %1519 = vmatpush.msra.mxu3 %v1463_v56 }
  0xc6   : > { %1448 = vst.msk [vmem:[%s2645_s11 + $0x10] sm:$0xff] %vm1444_vm2, %v1430_v2 }
  0xc7   : > { %v682_v4 = vpop.f32.mrf.mxu2 }
  0xc8   : > { %v697_v5 = vadd.f32 %v696_v58, %v682_v4  ;;  %v812_v6 = vpop.f32.mrf.mxu3  ;;  %v1462_v58 = vld [vmem:[%s2803_s3] sm:$0xff] }
  0xc9   : > { %1520 = vmatpush.msra.mxu3 %v1462_v58 }
  0xca   : > { %v1412_v8 = vmul.f32 %v2653_v61, %v697_v5 }
  0xcc   : > { %v1431_v9 = vadd.f32 %v2659_v0, %v1412_v8 }
  0xce   : > { %v798_v10 = vpop.f32.mrf.mxu1  ;;  %1449 = vst.msk [vmem:[%s2645_s11 + $0x18] sm:$0x3] %vm1446_vm3, %v1431_v9  ;;  %v2672_v11 = vsel %vm1483_vm4, %v1431_v9, %v1482_v7 }
  0xcf   : > { %v813_v12 = vadd.f32 %v812_v6, %v798_v10 }
  0xd0   : > { %v814_v16 = vpop.f32.mrf.mxu3 }
  0xd1   : > { %v1413_v13 = vmul.f32 %v2633_v51, %v813_v12 }
  0xd3   : > { %v930_v14 = vpop.f32.mrf.mxu2  ;;  %v1432_v15 = vadd.f32 %v2639_v53, %v1413_v13 }
  0xd5   : > { %1450 = vst.msk [vmem:[%s2645_s11 + $0x20] sm:$0xff] %vm1444_vm2, %v1432_v15  ;;  %v916_v17 = vpop.f32.mrf.mxu0 }
  0xd6   : > { %v800_v18 = vpop.f32.mrf.mxu1  ;;  %v931_v19 = vadd.f32 %v930_v14, %v916_v17 }
  0xd7   : > { %v815_v20 = vadd.f32 %v814_v16, %v800_v18 }
  0xd8   : > { %v1415_v21 = vmul.f32 %v2633_v51, %v931_v19 }
  0xd9   : > { %v1414_v22 = vmul.f32 %v2653_v61, %v815_v20 }
  0xda   : > { %v1434_v23 = vadd.f32 %v2639_v53, %v1415_v21 }
  0xdb   : > { %v2682_v24 = vadd.f32 %v2659_v0, %v1414_v22  ;;  %v932_v25 = vpop.f32.mrf.mxu2 }
  0xdc   : > { %1452 = vst.msk [vmem:[%s2645_s11 + $0x30] sm:$0xff] %vm1444_vm2, %v1434_v23 }
  0xdd   : > { %1451 = vst.msk [vmem:[%s2645_s11 + $0x28] sm:$0x3] %vm1446_vm3, %v2682_v24  ;;  %v918_v26 = vpop.f32.mrf.mxu0  ;;  %v1485_v18 = vrot.slane %v2682_v24, 7 }
  0xde   : > { %v933_v27 = vadd.f32 %v932_v25, %v918_v26 }
  0xdf   : > { %v1487_v25 = vsel %vm1486_vm5, %v1485_v18, %v2672_v11 }
  0xe0   : > { %v1416_v29 = vmul.f32 %v2653_v61, %v933_v27 }
  0xe2   : > { %v2697_v32 = vadd.f32 %v2659_v0, %v1416_v29 }
  0xe4   : > { %v1048_v30 = vpop.f32.mrf.mxu1  ;;  %1453 = vst.msk [vmem:[%s2645_s11 + $0x38] sm:$0x3] %vm1446_vm3, %v2697_v32  ;;  %v1488_v21 = vrot.slane %v2697_v32, 6 }
  0xe6   : > { %v1490_v26 = vsel %vm1489_vm6, %v1488_v21, %v1487_v25 }
  0xe8   : > { %v1034_v34 = vpop.f32.mrf.mxu3 }
  0xe9   : > { %v1049_v36 = vadd.f32 %v1048_v30, %v1034_v34  ;;  %v1166_v41 = vpop.f32.mrf.mxu0 }
  0xeb   : > { %v1417_v38 = vmul.f32 %v2633_v51, %v1049_v36 }
  0xec   : > { %v1050_v42 = vpop.f32.mrf.mxu1 }
  0xed   : > { %v1436_v40 = vadd.f32 %v2639_v53, %v1417_v38 }
  0xef   : > { %1454 = vst.msk [vmem:[%s2645_s11 + $0x40] sm:$0xff] %vm1444_vm2, %v1436_v40 }
  0xf0   : > { %v1036_v44 = vpop.f32.mrf.mxu3 }
  0xf1   : > { %v1051_v46 = vadd.f32 %v1050_v42, %v1036_v44  ;;  %v1168_v59 = vpop.f32.mrf.mxu0 }
  0xf3   : > { %v1152_v47 = vpop.f32.mrf.mxu2  ;;  %v1418_v50 = vmul.f32 %v2653_v61, %v1051_v46 }
  0xf4   : > { %v1167_v48 = vadd.f32 %v1166_v41, %v1152_v47 }
  0xf5   : > { %v1437_v55 = vadd.f32 %v2659_v0, %v1418_v50 }
  0xf6   : > { %v1419_v52 = vmul.f32 %v2633_v51, %v1167_v48 }
  0xf7   : > { %1455 = vst.msk [vmem:[%s2645_s11 + $0x48] sm:$0x3] %vm1446_vm3, %v1437_v55 }
  0xf8   : > { %v1438_v57 = vadd.f32 %v2639_v53, %v1419_v52 }
  0xfa   : > { %1456 = vst.msk [vmem:[%s2645_s11 + $0x50] sm:$0xff] %vm1444_vm2, %v1438_v57 }
  0xfb   : > { %v1154_v60 = vpop.f32.mrf.mxu2 }
  0xfc   : > { %v1169_v62 = vadd.f32 %v1168_v59, %v1154_v60  ;;  %v1284_v63 = vpop.f32.mrf.mxu3 }
  0xfe   : > { %v1420_v1 = vmul.f32 %v2653_v61, %v1169_v62 }
 0x100   : > { %v1439_v2 = vadd.f32 %v2659_v0, %v1420_v1 }
 0x102   : > { %v1270_v3 = vpop.f32.mrf.mxu1  ;;  %1457 = vst.msk [vmem:[%s2645_s11 + $0x58] sm:$0x3] %vm1446_vm3, %v1439_v2  ;;  %v1494_v23 = vrot.slane %v1439_v2, 4 }
 0x103   : > { %v1285_v4 = vadd.f32 %v1284_v63, %v1270_v3 }
 0x104   : > { %v1286_v8 = vpop.f32.mrf.mxu3 }
 0x105   : > { %v1421_v5 = vmul.f32 %v2633_v51, %v1285_v4  ;;  %v1402_v7 = vpop.f32.mrf.mxu2 }
 0x107   : > { %v1440_v6 = vadd.f32 %v2639_v53, %v1421_v5 }
 0x109   : > { %1458 = vst.msk [vmem:[%s2645_s11 + $0x60] sm:$0xff] %vm1444_vm2, %v1440_v6  ;;  %v1388_v9 = vpop.f32.mrf.mxu0 }
 0x10a   : > { %v1272_v10 = vpop.f32.mrf.mxu1  ;;  %v1403_v12 = vadd.f32 %v1402_v7, %v1388_v9 }
 0x10b   : > { %v1287_v13 = vadd.f32 %v1286_v8, %v1272_v10 }
 0x10c   : > { %v1423_v14 = vmul.f32 %v2633_v51, %v1403_v12  ;;  %v1491_v51 = vrot.slane %v1437_v55, 5 }
 0x10d   : > { %v1422_v15 = vmul.f32 %v2653_v61, %v1287_v13  ;;  %v1404_v19 = vpop.f32.mrf.mxu2 }
 0x10e   : > { %v1442_v16 = vadd.f32 %v2639_v53, %v1423_v14  ;;  %v1493_v28 = vsel %vm1492_vm7, %v1491_v51, %v1490_v26 }
 0x10f   : > { %v1441_v17 = vadd.f32 %v2659_v0, %v1422_v15  ;;  %v1496_v30 = vsel %vm1495_vm8, %v1494_v23, %v1493_v28 }
 0x110   : > { %1460 = vst.msk [vmem:[%s2645_s11 + $0x70] sm:$0xff] %vm1444_vm2, %v1442_v16 }
 0x111   : > { %1459 = vst.msk [vmem:[%s2645_s11 + $0x68] sm:$0x3] %vm1446_vm3, %v1441_v17  ;;  %v1390_v20 = vpop.f32.mrf.mxu0  ;;  %v1497_v24 = vrot.slane %v1441_v17, 3 }
 0x112   : > { %v1405_v22 = vadd.f32 %v1404_v19, %v1390_v20 }
 0x113   : > { %v1499_v31 = vsel %vm1498_vm9, %v1497_v24, %v1496_v30 }
 0x114   : > { %v1424_v53 = vmul.f32 %v2653_v61, %v1405_v22 }
 0x116   : > { %v1443_v27 = vadd.f32 %v2659_v0, %v1424_v53 }
 0x118   : > { %1461 = vst.msk [vmem:[%s2645_s11 + $0x78] sm:$0x3] %vm1446_vm3, %v1443_v27  ;;  %v1500_v29 = vrot.slane %v1443_v27, 2  ;;  %s1533_s11 = scalar_lea.sflag [#allocation3], %s227_s8 }
 0x11a   : > { %v1502_v32 = vsel %vm1501_vm10, %v1500_v29, %v1499_v31 }
 0x11b   : > { %2105 = vmatmul.msk.f32.vlgmr.msra.gmra.mxu3 %vm1444_vm2, %v1502_v32 }
 0x19e   : > { %v1522_v61 = vpop.f32.mrf.mxu3 }
 0x19f   : > { %1525 = vst [vmem:[%s229_s14] sm:$0xff] %v1522_v61 }
 0x1a0   : > { %2290 = shalt.err (!%p2287_p3)
}
 0x1a1   : > { %2224 = dma.vmem_to_hbm [thread:$0]  (%p2392_p5), %s1550_s15, 128, %s1552_s16, %s1533_s11  }
 0x1a2 PF: > { %p2230_p4 = scmp.ge.s32.totalorder %s2325_s21, 2  ;;  %s1572_s7 = sand.u32 1, %s2313_s18  }
 0x1a3   : > { %s1573_s8 = scalar_lea.sflag [#allocation3], %s1572_s7 }
 0x1a4   : > { %p2227_p7 = pnand %p2230_p4, %p2396_p6 }
 0x1a6   : > { %p2228_p8 = pneg %p2227_p7 }
 0x1a8   : > { %2308 = dma.done.wait (%p2228_p8), %s1573_s8, 128  }
 0x1a9   : > { %2310 = vsyncadd (%p2228_p8), %s1573_s8, 4294967168  ;;  %p16_p9 = scmp.ge.s32.totalorder %s2380_s24, 4   ;;  %s2808_s18 = smov %s2317_s19 }
 0x1aa   : > { %s2809_s19 = smov %s2321_s20  ;;  %s2810_s20 = smov %s2390_s27 }
 0x1ab   : > { %s2811_s21 = smov %s2380_s24  ;;  %18 = sbr.rel (!%p16_p9) target bundleno = 3 (0x3), region = 84 }
 0x1b0   :  { %1579 = vsyncpa [#allocation3], 1 }
 0x1b1   :  { %1581 = vsyncpa [#allocation3 + $0x1], 1 }

</bundles_post_ra>
